<compile_context>
chip_gen: v7x
topology: tpu7x:2x2x1
jax: 0.10.0
libtpu: 0.0.40
codegen_flags: <defaults>
</compile_context>

<pallas_src>
import functools

import jax
import jax.numpy as jnp
from jax import lax
from jax.experimental import pallas as pl
from jax.experimental.pallas import tpu as pltpu


def _round_up(x, m):
    return (x + m - 1) // m * m


def _nt_xent_kernel(rows_ref, cols_ref, pos_ref, out_ref, acc_ref, *,
                    inv_t, n_valid, tile):
    """One (row-block i, col-block j) step of the NT-Xent denominator sweep."""
    i = pl.program_id(0)
    j = pl.program_id(1)

    @pl.when(j == 0)
    def _init():
        acc_ref[...] = jnp.zeros_like(acc_ref)

    rows = rows_ref[...]                  # (TILE, Dp) f32, L2-normalized
    cols = cols_ref[...]                  # (TILE, Dp) f32, L2-normalized

    # sim tile = rows @ cols.T, contracting the last (lane) dim of both
    # operands -- feeds the MXU without materializing a transposed copy.
    sim = lax.dot_general(
        rows, cols,
        dimension_numbers=(((1,), (1,)), ((), ())),
        preferred_element_type=jnp.float32)             # (TILE, TILE)

    e = jnp.exp(sim * inv_t)

    # Drop the diagonal (k == m) and any zero-padded columns (m >= 2B).
    row_g = i * tile + lax.broadcasted_iota(jnp.int32, (tile, tile), 0)
    col_g = j * tile + lax.broadcasted_iota(jnp.int32, (tile, tile), 1)
    keep = jnp.logical_and(row_g != col_g, col_g < n_valid)
    e = jnp.where(keep, e, 0.0)

    acc_ref[...] += jnp.sum(e, axis=1, keepdims=True)   # (TILE, 1)

    @pl.when(j == pl.num_programs(1) - 1)
    def _finalize():
        denom = acc_ref[...]                             # (TILE, 1)
        # -log(exp(pos*inv_t) / denom) == log(denom) - pos*inv_t
        loss_rows = jnp.log(denom) - pos_ref[...] * inv_t
        r = i * tile + lax.broadcasted_iota(jnp.int32, (tile, 1), 0)
        out_ref[...] = jnp.where(r < n_valid, loss_rows, 0.0)


def contrastive_loss(emb_i, emb_j, temperature=0.5):
    """Pallas-TPU implementation of ContrastiveLoss.forward (NT-Xent)."""
    assert emb_i.shape == emb_j.shape and emb_i.ndim == 2
    b, d = emb_i.shape
    n = 2 * b
    eps = 1e-12  # torch.nn.functional.normalize default eps

    # --- cheap O(B*D) prep in plain JAX -------------------------------------
    zi = emb_i.astype(jnp.float32)
    zj = emb_j.astype(jnp.float32)
    zi = zi / jnp.maximum(jnp.sqrt(jnp.sum(zi * zi, axis=1, keepdims=True)), eps)
    zj = zj / jnp.maximum(jnp.sqrt(jnp.sum(zj * zj, axis=1, keepdims=True)), eps)

    reps = jnp.concatenate([zi, zj], axis=0)             # (2B, D)
    pos = jnp.sum(zi * zj, axis=1, keepdims=True)        # (B, 1)  == diag(sim,+B/-B)
    positives = jnp.concatenate([pos, pos], axis=0)      # (2B, 1)

    # --- pad to MXU/lane-friendly shapes ------------------------------------
    tile = 256 if n >= 256 else _round_up(n, 8)          # (TILE x TILE) sim tile
    n_pad = _round_up(n, tile)
    d_pad = _round_up(d, 128)

    reps_p = jnp.zeros((n_pad, d_pad), jnp.float32).at[:n, :d].set(reps)
    pos_p = jnp.zeros((n_pad, 1), jnp.float32).at[:n].set(positives)

    grid = (n_pad // tile, n_pad // tile)

    kernel = functools.partial(
        _nt_xent_kernel,
        inv_t=float(1.0 / temperature),
        n_valid=n,
        tile=tile,
    )

    loss_rows = pl.pallas_call(
        kernel,
        out_shape=jax.ShapeDtypeStruct((n_pad, 1), jnp.float32),
        grid_spec=pltpu.PrefetchScalarGridSpec(
            num_scalar_prefetch=0,
            grid=grid,
            in_specs=[
                pl.BlockSpec((tile, d_pad), lambda i, j: (i, 0)),   # row panel
                pl.BlockSpec((tile, d_pad), lambda i, j: (j, 0)),   # col panel
                pl.BlockSpec((tile, 1), lambda i, j: (i, 0)),       # positives
            ],
            out_specs=pl.BlockSpec((tile, 1), lambda i, j: (i, 0)),
            scratch_shapes=[pltpu.VMEM((tile, 1), jnp.float32)],
        ),
        compiler_params=pltpu.CompilerParams(
            # row blocks shard across TensorCores (v7x megacore);
            # column axis carries the denominator accumulator.
            dimension_semantics=("parallel", "arbitrary"),
            vmem_limit_bytes=48 * 1024 * 1024,
        ),
    )(reps_p, reps_p, pos_p)

    # Padded rows were written as 0, so a full sum is exact.
    return jnp.sum(loss_rows) / n


def _reference_loss(emb_i, emb_j, temperature=0.5):
    # Pure-JAX mirror of the PyTorch module, for sanity checking.
    eps = 1e-12
    zi = emb_i / jnp.maximum(jnp.linalg.norm(emb_i, axis=1, keepdims=True), eps)
    zj = emb_j / jnp.maximum(jnp.linalg.norm(emb_j, axis=1, keepdims=True), eps)
    reps = jnp.concatenate([zi, zj], axis=0)
    sim = reps @ reps.T
    b = emb_i.shape[0]
    n = 2 * b
    sim_ij = jnp.diagonal(sim, offset=b)
    sim_ji = jnp.diagonal(sim, offset=-b)
    positives = jnp.concatenate([sim_ij, sim_ji], axis=0)
    mask = 1.0 - jnp.eye(n, dtype=jnp.float32)
    nominator = jnp.exp(positives / temperature)
    denom = jnp.sum(mask * jnp.exp(sim / temperature), axis=1)
    return jnp.sum(-jnp.log(nominator / denom)) / n


if __name__ == "__main__":
    # Module spec: embeddings (B, D), temperature=0.5, negatives_mask=~eye(2B).
    B, D = 8, 32
    key = jax.random.PRNGKey(0)
    k1, k2 = jax.random.split(key)
    emb_i = jax.random.normal(k1, (B, D), dtype=jnp.float32)
    emb_j = jax.random.normal(k2, (B, D), dtype=jnp.float32)

    loss = contrastive_loss(emb_i, emb_j, temperature=0.5)
    loss = jax.block_until_ready(loss)

    ref = _reference_loss(emb_i, emb_j, temperature=0.5)
    assert jnp.allclose(loss, ref, rtol=1e-5, atol=1e-5), (loss, ref)

    print("KERNEL_OK")
</pallas_src>

<mosaic_0001>
module attributes {stable_mosaic.version = 11 : i64} {
  func.func @_nt_xent_kernel(%arg0: i32, %arg1: i32, %arg2: memref<16x128xf32, #tpu.memory_space<vmem>>, %arg3: memref<16x128xf32, #tpu.memory_space<vmem>>, %arg4: memref<16x1xf32, #tpu.memory_space<vmem>>, %arg5: memref<16x1xf32, #tpu.memory_space<vmem>>, %arg6: memref<16x1xf32, #tpu.memory_space<vmem>>) attributes {dimension_semantics = [#tpu.dimension_semantics<parallel>, #tpu.dimension_semantics<arbitrary>], iteration_bounds = array<i64: 1, 1>, scalar_prefetch = 0 : i64, scratch_operands = 1 : i64, tpu.core_type = #tpu.core_type<tc>, window_params = [{transform_indices = @transform_0, window_bounds = array<i64: 16, 128>}, {transform_indices = @transform_1, window_bounds = array<i64: 16, 128>}, {transform_indices = @transform_2, window_bounds = array<i64: 16, 1>}, {transform_indices = @transform_3, window_bounds = array<i64: 16, 1>}]} {
    %c0_i32 = arith.constant 0 : i32
    %0 = arith.cmpi eq, %arg1, %c0_i32 : i32
    %1 = arith.extui %0 : i1 to i32
    %c0_i32_0 = arith.constant 0 : i32
    %2 = arith.cmpi ne, %1, %c0_i32_0 : i32
    scf.if %2 {
      %cst_15 = arith.constant 0.000000e+00 : f32
      %31 = vector.broadcast %cst_15 : f32 to vector<16x1xf32>
      %c0_16 = arith.constant 0 : index
      %c0_17 = arith.constant 0 : index
      %32 = vector.load %arg6[%c0_16, %c0_17] : memref<16x1xf32, #tpu.memory_space<vmem>>, vector<16x1xf32>
      tpu.vector_store %arg6[%c0_16, %c0_17], %31 {strides = array<i32>} : memref<16x1xf32, #tpu.memory_space<vmem>>, vector<16x1xf32>,
    } else {
    }
    %c0 = arith.constant 0 : index
    %c0_1 = arith.constant 0 : index
    %3 = vector.load %arg2[%c0, %c0_1] : memref<16x128xf32, #tpu.memory_space<vmem>>, vector<16x128xf32>
    %c0_2 = arith.constant 0 : index
    %c0_3 = arith.constant 0 : index
    %4 = vector.load %arg3[%c0_2, %c0_3] : memref<16x128xf32, #tpu.memory_space<vmem>>, vector<16x128xf32>
    %cst = arith.constant dense<0.000000e+00> : vector<16x16xf32>
    %5 = tpu.matmul %3, %4, %cst {dimension_numbers = #tpu.dot_dimension_numbers<[1], [1], [0], [0], [0, 0, 1, 0], [], []>} : vector<16x128xf32>, vector<16x128xf32>, vector<16x16xf32> -> vector<16x16xf32>
    %cst_4 = arith.constant 2.000000e+00 : f32
    %6 = vector.broadcast %cst_4 : f32 to vector<16x16xf32>
    %7 = arith.mulf %5, %6 : vector<16x16xf32>
    %8 = math.exp %7 : vector<16x16xf32>
    %c16_i32 = arith.constant 16 : i32
    %9 = arith.muli %arg0, %c16_i32 : i32
    %10 = tpu.iota {dimensions = array<i32: 0>} : vector<16x16xi32>
    %11 = vector.broadcast %9 : i32 to vector<16x16xi32>
    %12 = arith.addi %11, %10 : vector<16x16xi32>
    %c16_i32_5 = arith.constant 16 : i32
    %13 = arith.muli %arg1, %c16_i32_5 : i32
    %14 = tpu.iota {dimensions = array<i32: 1>} : vector<16x16xi32>
    %15 = vector.broadcast %13 : i32 to vector<16x16xi32>
    %16 = arith.addi %15, %14 : vector<16x16xi32>
    %17 = arith.cmpi ne, %12, %16 : vector<16x16xi32>
    %c16_i32_6 = arith.constant 16 : i32
    %18 = vector.broadcast %c16_i32_6 : i32 to vector<16x16xi32>
    %19 = arith.cmpi slt, %16, %18 : vector<16x16xi32>
    %20 = arith.andi %17, %19 : vector<16x16xi1>
    %cst_7 = arith.constant 0.000000e+00 : f32
    %21 = vector.broadcast %cst_7 : f32 to vector<16x16xf32>
    %22 = arith.select %20, %8, %21 : vector<16x16xi1>, vector<16x16xf32>
    %c0_8 = arith.constant 0 : index
    %c0_9 = arith.constant 0 : index
    %23 = vector.load %arg6[%c0_8, %c0_9] : memref<16x1xf32, #tpu.memory_space<vmem>>, vector<16x1xf32>
    %cst_10 = arith.constant dense<0.000000e+00> : vector<16xf32>
    %24 = vector.multi_reduction <add>, %22, %cst_10 [1] : vector<16x16xf32> to vector<16xf32>
    %25 = vector.shape_cast %24 : vector<16xf32> to vector<16x1xf32>
    %26 = arith.addf %23, %25 : vector<16x1xf32>
    %c0_11 = arith.constant 0 : index
    %c0_12 = arith.constant 0 : index
    %27 = vector.load %arg6[%c0_11, %c0_12] : memref<16x1xf32, #tpu.memory_space<vmem>>, vector<16x1xf32>
    tpu.vector_store %arg6[%c0_11, %c0_12], %26 {strides = array<i32>} : memref<16x1xf32, #tpu.memory_space<vmem>>, vector<16x1xf32>,
    %c0_i32_13 = arith.constant 0 : i32
    %28 = arith.cmpi eq, %arg1, %c0_i32_13 : i32
    %29 = arith.extui %28 : i1 to i32
    %c0_i32_14 = arith.constant 0 : i32
    %30 = arith.cmpi ne, %29, %c0_i32_14 : i32
    scf.if %30 {
      %c0_15 = arith.constant 0 : index
      %c0_16 = arith.constant 0 : index
      %31 = vector.load %arg6[%c0_15, %c0_16] : memref<16x1xf32, #tpu.memory_space<vmem>>, vector<16x1xf32>
      %32 = math.log %31 : vector<16x1xf32>
      %c0_17 = arith.constant 0 : index
      %c0_18 = arith.constant 0 : index
      %33 = vector.load %arg4[%c0_17, %c0_18] : memref<16x1xf32, #tpu.memory_space<vmem>>, vector<16x1xf32>
      %cst_19 = arith.constant 2.000000e+00 : f32
      %34 = vector.broadcast %cst_19 : f32 to vector<16x1xf32>
      %35 = arith.mulf %33, %34 : vector<16x1xf32>
      %36 = arith.subf %32, %35 : vector<16x1xf32>
      %c16_i32_20 = arith.constant 16 : i32
      %37 = arith.muli %arg0, %c16_i32_20 : i32
      %38 = tpu.iota {dimensions = array<i32: 0>} : vector<16x1xi32>
      %39 = vector.broadcast %37 : i32 to vector<16x1xi32>
      %40 = arith.addi %39, %38 : vector<16x1xi32>
      %c16_i32_21 = arith.constant 16 : i32
      %41 = vector.broadcast %c16_i32_21 : i32 to vector<16x1xi32>
      %42 = arith.cmpi slt, %40, %41 : vector<16x1xi32>
      %cst_22 = arith.constant 0.000000e+00 : f32
      %43 = vector.broadcast %cst_22 : f32 to vector<16x1xf32>
      %44 = arith.select %42, %36, %43 : vector<16x1xi1>, vector<16x1xf32>
      %c0_23 = arith.constant 0 : index
      %c0_24 = arith.constant 0 : index
      %45 = vector.load %arg5[%c0_23, %c0_24] : memref<16x1xf32, #tpu.memory_space<vmem>>, vector<16x1xf32>
      tpu.vector_store %arg5[%c0_23, %c0_24], %44 {strides = array<i32>} : memref<16x1xf32, #tpu.memory_space<vmem>>, vector<16x1xf32>,
    } else {
    }
    return
  }
  func.func @transform_0(%arg0: i32, %arg1: i32) -> (i32, i32) {
    %c0_i32 = arith.constant 0 : i32
    %c0_i32_0 = arith.constant 0 : i32
    return %arg0, %c0_i32 : i32, i32
  }
  func.func @transform_1(%arg0: i32, %arg1: i32) -> (i32, i32) {
    %c0_i32 = arith.constant 0 : i32
    %c0_i32_0 = arith.constant 0 : i32
    return %arg1, %c0_i32 : i32, i32
  }
  func.func @transform_2(%arg0: i32, %arg1: i32) -> (i32, i32) {
    %c0_i32 = arith.constant 0 : i32
    %c0_i32_0 = arith.constant 0 : i32
    return %arg0, %c0_i32 : i32, i32
  }
  func.func @transform_3(%arg0: i32, %arg1: i32) -> (i32, i32) {
    %c0_i32 = arith.constant 0 : i32
    %c0_i32_0 = arith.constant 0 : i32
    return %arg0, %c0_i32 : i32, i32
  }
}

</mosaic_0001>

<bundles_post_ra>
// kernel: tpu_custom_call.1
= control target key start
LH: loop header
LB: loop body
LE: loop exit
PB: predicated region body
PF: predicated region fallthrough
CT: control target
= control target key end

     0   :  { %8 = vsyncpa [#allocation4], 0  ;;  %s230_s12 = smov [#allocation3]   ;;  %s290_s0 = inlined_call_operand.vmem [shape: f32[16,128], index: 0, kind: input, shape index: {}]   ;;  %s291_s1 = inlined_call_operand.hbm [shape: f32[16,128], index: 1, kind: input, shape index: {}]   ;;  %s292_s2 = inlined_call_operand.vmem [shape: f32[16,1], index: 2, kind: input, shape index: {}]   ;;  %s293_s3 = inlined_call_operand.vmem [shape: f32[16,1], index: 3, kind: output, shape index: {}]  }
   0x1   :  { %s16_s13 = sshll.u32 %s230_s12, 4  ;;  %s206_s16 = scalar_lea.hbm %s291_s1, 256  ;;  %s17_s13 = int_to_ptr.vmem [resolvable:$true] %s16_s13 }
   0x2   :  { %p207_p0 = scmp.ne.s32.totalorder %s291_s1, %s206_s16  ;;  %p210_p1 = scmp.lt.u32.totalorder %s206_s16, %s291_s1 }
   0x4   :  { %p212_p2 = pnand %p210_p1, %p207_p0 }
   0x6   :  { %215 = shalt.err (!%p212_p2)
}
   0x7   :  { %s216_s21 = scalar_lea.vmem %s17_s13, 256  ;;  %p221_p4 = scmp.lt.s32.totalorder %s17_s13, %s17_s13 }
   0x8   :  { %p217_p3 = scmp.ne.s32.totalorder %s17_s13, %s216_s21  ;;  %p222_p5 = scmp.lt.s32.totalorder %s216_s21, %s216_s21 }
   0xa   :  { %p223_p6 = por %p222_p5, %p221_p4 }
   0xc   :  { %p224_p7 = pnand %p223_p6, %p217_p3 }
   0xe   :  { %227 = shalt.err (!%p224_p7)
}
   0xf   :  { %s231_s22 = smov 128   ;;  %s232_s23 = smov 8  }
  0x10   :  { %22 = dma.hbm_to_vmem [thread:$0]  %s291_s1, 256, %s17_s13, [#allocation4], %s231_s22, %s231_s22, %s232_s23  }
  0x11   :  { %228 = dma.done.wait [#allocation4], 256  }
  0x12   :  { %229 = vsyncadd [#allocation4], 4294967040  ;;  %v37_v0 = vld [vmem:[#allocation3] sm:$0xff]  ;;  %v38_v1 = vld [vmem:[#allocation3 + $0x8] sm:$0xff]  ;;  %vm32_vm0 = vcmask 7168   ;;  %v233_v5 = vmov 0.0   ;;  %v121_v9 = vlaneseq }
  0x13   :  { %v35_v2 = vld [vmem:[%s290_s0] sm:$0xff]  ;;  %v190_v3 = vpack.c.bf16 %v38_v1, %v37_v0  ;;  %v36_v4 = vld [vmem:[%s290_s0 + $0x8] sm:$0xff]  ;;  %33 = vst.msk [vmem:[#allocation2] sm:$0xff] %vm32_vm0, %v233_v5  ;;  %34 = vst.msk [vmem:[#allocation2 + $0x8] sm:$0xff] %vm32_vm0, %v233_v5  ;;  %vm141_vm5 = vcmask 130048  }
  0x14   :  { %187 = vmatprep.mubr.f32.mxu0 %v35_v2  ;;  %v122_v13 = vshrl.u32 %v121_v9, 7  ;;  %v129_v14 = vand.u32 127, %v121_v9  ;;  %v162_v30 = vld [vmem:[%s292_s2] sm:$0xff]  ;;  %v163_v33 = vld [vmem:[%s292_s2 + $0x8] sm:$0xff] }
  0x15   :  { %191 = vmatprep.subr.bf16.mxu0 %v190_v3  ;;  %v164_v31 = vmul.f32 2.0, %v162_v30  ;;  %v165_v36 = vmul.f32 2.0, %v163_v33 }
  0x16   :  { %193 = vmatpush3.bf16.xpose.msra.mxu0 %v190_v3  ;;  %v123_v15 = vadd.s32 8, %v122_v13  ;;  %vm132_vm1 = vcmp.ne.s32.totalorder %v122_v13, %v129_v14  ;;  %vm134_vm2 = vcmp.lt.s32.totalorder %v129_v14, 16 }
  0x17   :  { %vm135_vm4 = vmand %vm132_vm1, %vm134_vm2 }
  0x18   :  { %vm133_vm3 = vcmp.ne.s32.totalorder %v123_v15, %v129_v14 }
  0x19   :  { %vm136_vm6 = vmand %vm133_vm3, %vm134_vm2 }
  0x1a   :  { %v139_v22 = vld [vmem:[#allocation2] sm:$0xff]  ;;  %v140_v25 = vld [vmem:[#allocation2 + $0x8] sm:$0xff] }
  0x1d   :  { %188 = vmatmul.mubr.f32.vlgmr.msra.gmra.mrb[0].mxu0 %v36_v4 }
  0xf0   :  { %v189_v6 = vpop.f32.mrb[0].mxu0 }
  0xf1   :  { %v115_v7 = vmul.f32 2.0, %v189_v6  ;;  %v105_v8 = vpop.f32.mrb[1].mxu0 }
  0xf2   :  { %v114_v10 = vmul.f32 2.0, %v105_v8 }
  0xf3   :  { %v118_v11 = vmul.f32 1.442695, %v115_v7 }
  0xf4   :  { %v116_v12 = vmul.f32 1.442695, %v114_v10 }
  0xf5   :  { %198 = vpow2.f32 %v118_v11 }
  0xf6   :  { %200 = vpow2.f32 %v116_v12 }
  0xff   :  { %v199_v16 = vpop.eup %198 }
 0x100   :  { %v201_v17 = vpop.eup %200  ;;  %v138_v20 = vsel %vm136_vm6, %v199_v16, 0.0 }
 0x101   :  { %v137_v18 = vsel %vm135_vm4, %v201_v17, 0.0  ;;  %v145_v21 = vsel %vm141_vm5, %v138_v20, 0.0 }
 0x102   :  { %v142_v19 = vsel %vm141_vm5, %v137_v18, 0.0 }
 0x103   :  { %143 = vadd.xlane.f32.xlu0 %v142_v19 }
 0x107   :  { %146 = vadd.xlane.f32.xlu0 %v145_v21 }
 0x190   :  { %v144_v23 = vpop.xlane.xlu0 %143 }
 0x191   :  { %v148_v24 = vadd.f32 %v144_v23, %v139_v22 }
 0x193   :  { %151 = vst.msk [vmem:[#allocation2] sm:$0xff] %vm32_vm0, %v148_v24 }
 0x194   :  { %v147_v26 = vpop.xlane.xlu0 %146 }
 0x195   :  { %v149_v27 = vadd.f32 %v147_v26, %v140_v25 }
 0x197   :  { %152 = vst.msk [vmem:[#allocation2 + $0x8] sm:$0xff] %vm32_vm0, %v149_v27 }
 0x19a   :  { %v156_v28 = vld [vmem:[#allocation2] sm:$0xff] }
 0x19b   :  { %202 = vlog2.f32 %v156_v28 }
 0x19e   :  { %v157_v29 = vld [vmem:[#allocation2 + $0x8] sm:$0xff] }
 0x19f   :  { %204 = vlog2.f32 %v157_v29 }
 0x1a5   :  { %v203_v32 = vpop.eup %202 }
 0x1a6   :  { %v159_v34 = vmul.f32 0.6931472, %v203_v32 }
 0x1a8   :  { %v166_v35 = vsub.f32 %v159_v34, %v164_v31 }
 0x1a9   :  { %v205_v37 = vpop.eup %204 }
 0x1aa   :  { %172 = vst.msk [vmem:[%s293_s3] sm:$0xff] %vm32_vm0, %v166_v35  ;;  %v161_v38 = vmul.f32 0.6931472, %v205_v37 }
 0x1ac   :  { %v167_v39 = vsub.f32 %v161_v38, %v165_v36 }
 0x1ae   :  { %173 = vst.msk [vmem:[%s293_s3 + $0x8] sm:$0xff] %vm32_vm0, %v167_v39 }
 0x1af   :  { %178 = vsyncpa [#allocation4], 1 }

</bundles_post_ra>
